<compile_context>
chip_gen: v5e
topology: v5e:2x2
jax: 0.10.0
libtpu: 0.0.40
codegen_flags: <defaults>
</compile_context>

<pallas_src>
import functools
import math

import jax
import jax.numpy as jnp
from jax.experimental import pallas as pl
from jax.experimental.pallas import tpu as pltpu


# --------------------------------------------------------------------------- #
# Helpers
# --------------------------------------------------------------------------- #
def _pick_tile(n, target):
    """Largest divisor of n that is <= target and a multiple of 8 (else n)."""
    if n <= target:
        return n
    for cand in range(min(target, n), 0, -1):
        if n % cand == 0 and cand % 8 == 0:
            return cand
    return n


def _vmem_limit(entries, scratch_bytes):
    """entries: iterable of (num_elems, bytes_per_elem, buffer_count)."""
    total = scratch_bytes + sum(n * b * c for n, b, c in entries)
    total = int(total * 1.5) + (2 << 20)     # headroom for Mosaic internals
    return int(min(48 << 20, max(32 << 20, total)))


def prepare_params(wqkv, bqkv, wo, bo, *, num_heads, compute_dtype=jnp.bfloat16):
    """One-time parameter preparation (do once, not per call).

    Folds 1/sqrt(head_size) into the Q columns of the merged QKV projection,
    reshapes the output projection to (H, d, E) for the fused head merge, and
    casts MXU operands to the compute dtype (biases stay f32).
    """
    E = wo.shape[0]
    assert E % num_heads == 0
    d = E // num_heads
    scale = 1.0 / math.sqrt(d)
    col_scale = jnp.concatenate([
        jnp.full((E,), scale, dtype=jnp.float32),
        jnp.ones((2 * E,), dtype=jnp.float32)])
    wqkv_s = wqkv.astype(jnp.float32) * col_scale[None, :]
    bqkv_s = bqkv.astype(jnp.float32).reshape(1, 3 * E) * col_scale[None, :]
    return dict(
        wqkv=wqkv_s.astype(compute_dtype),                        # (E, 3E)
        bqkv=bqkv_s,                                               # (1, 3E) f32
        wo_h=wo.reshape(num_heads, d, E).astype(compute_dtype),   # (H, d, E)
        bo=bo.astype(jnp.float32).reshape(1, E),                   # (1, E) f32
    )


# --------------------------------------------------------------------------- #
# Kernel 1: merged QKV projection + head split
# --------------------------------------------------------------------------- #
def qkv_proj_kernel(x_ref, wqkv_ref, bqkv_ref, q_ref, k_ref, v_ref, qkv_sc,
                    *, num_heads, head_size):
    """One (TM, E) row tile of one batch element."""
    E = num_heads * head_size
    # Lane-dense (TM,E)x(E,3E) MXU matmul, f32 accumulation, ONE dense store.
    qkv_sc[...] = (jnp.dot(x_ref[...], wqkv_ref[...],
                           preferred_element_type=jnp.float32)
                   + bqkv_ref[...])
    # Head split: read d-wide slices back from the scratch ref (bounded live
    # range, no (TM,3E) value kept live across the unrolled loop).
    cdt = q_ref.dtype
    for h in range(num_heads):
        lo = h * head_size
        q_ref[h] = qkv_sc[:, lo:lo + head_size].astype(cdt)        # pre-scaled (folded weights)
        k_ref[h] = qkv_sc[:, E + lo:E + lo + head_size].astype(cdt)
        v_ref[h] = qkv_sc[:, 2 * E + lo:2 * E + lo + head_size].astype(cdt)


def _qkv_projection(x, params, *, num_heads, head_size, tile_m, single_buffer):
    B, S, E = x.shape
    H, d = num_heads, head_size
    compute_dtype = params['wqkv'].dtype
    itemsize = jnp.dtype(compute_dtype).itemsize
    nr = S // tile_m

    def w_spec(shape, idx):
        if single_buffer:
            return pl.BlockSpec(shape, idx, pipeline_mode=pl.Buffered(1))
        return pl.BlockSpec(shape, idx)

    wb = 1 if single_buffer else 2
    vmem = _vmem_limit(
        [(tile_m * E, itemsize, 2),                 # x tile (double-buffered)
         (E * 3 * E, itemsize, wb),                 # wqkv (grid-invariant)
         (3 * E, 4, wb),                            # bqkv
         (H * tile_m * d, itemsize, 2 * 3)],        # q/k/v output tiles
        scratch_bytes=tile_m * 3 * E * 4)

    head_shape = jax.ShapeDtypeStruct((B, H, S, d), compute_dtype)
    kernel = functools.partial(qkv_proj_kernel, num_heads=H, head_size=d)
    return pl.pallas_call(
        kernel,
        out_shape=(head_shape, head_shape, head_shape),
        grid=(B, nr),
        in_specs=[
            pl.BlockSpec((pl.Squeezed(), tile_m, E), lambda b, r: (b, r, 0)),
            w_spec((E, 3 * E), lambda b, r: (0, 0)),
            w_spec((1, 3 * E), lambda b, r: (0, 0)),
        ],
        out_specs=(
            pl.BlockSpec((pl.Squeezed(), H, tile_m, d), lambda b, r: (b, 0, r, 0)),
            pl.BlockSpec((pl.Squeezed(), H, tile_m, d), lambda b, r: (b, 0, r, 0)),
            pl.BlockSpec((pl.Squeezed(), H, tile_m, d), lambda b, r: (b, 0, r, 0)),
        ),
        scratch_shapes=[pltpu.VMEM((tile_m, 3 * E), jnp.float32)],
        compiler_params=pltpu.CompilerParams(
            dimension_semantics=("parallel", "parallel"),
            vmem_limit_bytes=vmem),
    )(x.astype(compute_dtype), params['wqkv'], params['bqkv'])


# --------------------------------------------------------------------------- #
# Kernel 2: flash attention (online softmax over KV tiles) + output projection
# --------------------------------------------------------------------------- #
def flash_attn_kernel(q_ref, k_ref, v_ref, wo_ref, bo_ref, o_ref,
                      m_sc, l_sc, acc_sc):
    """One (batch, q-tile) cell; streams KV tiles with a running softmax."""
    ki = pl.program_id(2)

    @pl.when(ki == 0)
    def _():
        m_sc[...] = jnp.full(m_sc.shape, -jnp.inf, m_sc.dtype)
        l_sc[...] = jnp.zeros(l_sc.shape, l_sc.dtype)
        acc_sc[...] = jnp.zeros(acc_sc.shape, acc_sc.dtype)

    q = q_ref[...]                                    # (H, TQ, d) bf16, pre-scaled
    k = k_ref[...]                                    # (H, TK, d) bf16
    # Head-batched QK^T; contraction on the last dim of both operands.
    s = jnp.einsum('hqd,hkd->hqk', q, k,
                   preferred_element_type=jnp.float32)       # (H, TQ, TK) f32

    m_prev = m_sc[...]
    m_new = jnp.maximum(m_prev, jnp.max(s, axis=-1, keepdims=True))
    alpha = jnp.exp(m_prev - m_new)                   # (H, TQ, 1)
    p = jnp.exp(s - m_new)                            # (H, TQ, TK) f32
    l_sc[...] = alpha * l_sc[...] + jnp.sum(p, axis=-1, keepdims=True)
    acc_sc[...] = alpha * acc_sc[...] + jnp.einsum(
        'hqk,hkd->hqd', p.astype(v_ref.dtype), v_ref[...],
        preferred_element_type=jnp.float32)           # (H, TQ, d) f32
    m_sc[...] = m_new

    @pl.when(ki == pl.num_programs(2) - 1)
    def _():
        # Normalize (EUP reciprocal) and fold the head merge into the output
        # projection: lane-dense (TQ, E) result, no (S, E) merge scratch.
        ctx = (acc_sc[...] * pl.reciprocal(l_sc[...], approx=True)
               ).astype(wo_ref.dtype)                 # (H, TQ, d) bf16
        per_head = jnp.einsum('hqd,hde->hqe', ctx, wo_ref[...],
                              preferred_element_type=jnp.float32)  # (H, TQ, E)
        out = jnp.sum(per_head, axis=0) + bo_ref[...]              # (TQ, E) f32
        o_ref[...] = out.astype(o_ref.dtype)


def _flash_attention(qh, kh, vh, params, out_dtype, *, tile_q, tile_kv,
                     single_buffer):
    B, H, S, d = qh.shape
    E = H * d
    nq, nkv = S // tile_q, S // tile_kv
    compute_dtype = params['wo_h'].dtype
    itemsize = jnp.dtype(compute_dtype).itemsize

    def w_spec(shape, idx):
        if single_buffer:
            return pl.BlockSpec(shape, idx, pipeline_mode=pl.Buffered(1))
        return pl.BlockSpec(shape, idx)

    wb = 1 if single_buffer else 2
    vmem = _vmem_limit(
        [(H * tile_q * d, itemsize, 2),               # q tile
         (H * tile_kv * d, itemsize, 2 * 2),          # k, v tiles
         (E * E, itemsize, wb),                       # wo_h (grid-invariant)
         (E, 4, wb),                                  # bo
         (tile_q * E, jnp.dtype(out_dtype).itemsize, 2)],  # output tile
        scratch_bytes=(2 * H * tile_q + H * tile_q * d) * 4
        + 2 * H * tile_q * tile_kv * 4)               # live scores/probs headroom

    return pl.pallas_call(
        flash_attn_kernel,
        out_shape=jax.ShapeDtypeStruct((B, S, E), out_dtype),
        grid=(B, nq, nkv),
        in_specs=[
            pl.BlockSpec((pl.Squeezed(), H, tile_q, d),
                         lambda b, qi, ki: (b, 0, qi, 0)),
            pl.BlockSpec((pl.Squeezed(), H, tile_kv, d),
                         lambda b, qi, ki: (b, 0, ki, 0)),
            pl.BlockSpec((pl.Squeezed(), H, tile_kv, d),
                         lambda b, qi, ki: (b, 0, ki, 0)),
            w_spec((H, d, E), lambda b, qi, ki: (0, 0, 0)),
            w_spec((1, E), lambda b, qi, ki: (0, 0)),
        ],
        out_specs=pl.BlockSpec((pl.Squeezed(), tile_q, E),
                               lambda b, qi, ki: (b, qi, 0)),
        scratch_shapes=[
            pltpu.VMEM((H, tile_q, 1), jnp.float32),   # running max
            pltpu.VMEM((H, tile_q, 1), jnp.float32),   # running sum
            pltpu.VMEM((H, tile_q, d), jnp.float32),   # output accumulator
        ],
        compiler_params=pltpu.CompilerParams(
            dimension_semantics=("parallel", "parallel", "arbitrary"),
            vmem_limit_bytes=vmem),
    )(qh, kh, vh, params['wo_h'], params['bo'])


# --------------------------------------------------------------------------- #
# Public wrapper
# --------------------------------------------------------------------------- #
def _faster_mha(x, params, *, num_heads, single_buffer):
    B, S, E = x.shape
    assert E % num_heads == 0
    d = E // num_heads
    tile_m = _pick_tile(S, 256)
    tile_q = _pick_tile(S, 256)    # >=256 rows feeds the 256-wide MXU on v6e/v7x
    tile_kv = _pick_tile(S, 512)
    qh, kh, vh = _qkv_projection(x, params, num_heads=num_heads, head_size=d,
                                 tile_m=tile_m, single_buffer=single_buffer)
    return _flash_attention(qh, kh, vh, params, x.dtype,
                            tile_q=tile_q, tile_kv=tile_kv,
                            single_buffer=single_buffer)


def faster_mha(x, params, *, num_heads):
    """Forward pass of FasterMultiHeadAttention (eval mode).

    x: (B, S, E); params: output of prepare_params(...).
    """
    try:
        out = _faster_mha(x, params, num_heads=num_heads, single_buffer=True)
        jax.block_until_ready(out)
        return out
    except Exception:
        # Fallback for JAX builds where pipeline_mode=pl.Buffered(1) is not
        # supported on grid-invariant operands (weights then double-buffer).
        return _faster_mha(x, params, num_heads=num_heads, single_buffer=False)


# --------------------------------------------------------------------------- #
# Pure-JAX f32 reference (mirrors the PyTorch forward)
# --------------------------------------------------------------------------- #
def mha_reference(x, wqkv, bqkv, wo, bo, *, num_heads):
    B, S, E = x.shape
    d = E // num_heads
    qkv = x @ wqkv + bqkv[0]
    q, k, v = jnp.split(qkv, 3, axis=-1)

    def heads(t):  # (B,S,E) -> (B,H,S,d)
        return t.reshape(B, S, num_heads, d).transpose(0, 2, 1, 3)

    q, k, v = heads(q), heads(k), heads(v)
    scores = jnp.einsum('bhqd,bhkd->bhqk', q, k) / math.sqrt(d)
    probs = jax.nn.softmax(scores, axis=-1)
    out = jnp.einsum('bhqk,bhkd->bhqd', probs, v)
    out = out.transpose(0, 2, 1, 3).reshape(B, S, E)
    return out @ wo + bo[0]


if __name__ == "__main__":
    # Small, deterministic demo config (matches the module's forward contract).
    config = dict(embed_size=32, num_heads=4, qkv_bias=True,
                  attention_probs_dropout_prob=0.0, hidden_dropout_prob=0.0)
    B, S, E = 2, 8, config['embed_size']
    H = config['num_heads']

    key = jax.random.PRNGKey(0)
    kx, k1, k2, k3, k4 = jax.random.split(key, 5)

    x = jax.random.normal(kx, (B, S, E), dtype=jnp.float32)
    wqkv = jax.random.normal(k1, (E, 3 * E), dtype=jnp.float32) * (1.0 / math.sqrt(E))
    bqkv = jax.random.normal(k2, (1, 3 * E), dtype=jnp.float32) * 0.01
    wo = jax.random.normal(k3, (E, E), dtype=jnp.float32) * (1.0 / math.sqrt(E))
    bo = jax.random.normal(k4, (1, E), dtype=jnp.float32) * 0.01

    params = prepare_params(wqkv, bqkv, wo, bo, num_heads=H)
    out = faster_mha(x, params, num_heads=H)
    out = jax.block_until_ready(out)

    ref = mha_reference(x, wqkv, bqkv, wo, bo, num_heads=H)
    assert out.shape == (B, S, E)
    # bf16 MXU operands + approximate reciprocal => relaxed tolerance vs f32 reference.
    err = float(jnp.max(jnp.abs(out.astype(jnp.float32) - ref)))
    assert jnp.allclose(out.astype(jnp.float32), ref, atol=5e-2, rtol=5e-2), \
        f"mismatch vs reference, max |err| = {err}"

    print("KERNEL_OK")
</pallas_src>

<mosaic_0001>
module attributes {stable_mosaic.version = 11 : i64} {
  func.func @qkv_proj_kernel(%arg0: i32, %arg1: i32, %arg2: memref<1x8x32xbf16, #tpu.memory_space<vmem>>, %arg3: memref<32x96xbf16, #tpu.memory_space<vmem>>, %arg4: memref<1x96xf32, #tpu.memory_space<vmem>>, %arg5: memref<1x4x8x8xbf16, #tpu.memory_space<vmem>>, %arg6: memref<1x4x8x8xbf16, #tpu.memory_space<vmem>>, %arg7: memref<1x4x8x8xbf16, #tpu.memory_space<vmem>>, %arg8: memref<8x96xf32, #tpu.memory_space<vmem>>) attributes {dimension_semantics = [#tpu.dimension_semantics<parallel>, #tpu.dimension_semantics<parallel>], iteration_bounds = array<i64: 2, 1>, scalar_prefetch = 0 : i64, scratch_operands = 1 : i64, tpu.core_type = #tpu.core_type<tc>, window_params = [{transform_indices = @transform_0, window_bounds = array<i64: 1, 8, 32>}, {pipeline_mode = #tpu.pipeline_mode<synchronous>, transform_indices = @transform_1, window_bounds = array<i64: 32, 96>}, {pipeline_mode = #tpu.pipeline_mode<synchronous>, transform_indices = @transform_2, window_bounds = array<i64: 1, 96>}, {transform_indices = @transform_3, window_bounds = array<i64: 1, 4, 8, 8>}, {transform_indices = @transform_4, window_bounds = array<i64: 1, 4, 8, 8>}, {transform_indices = @transform_5, window_bounds = array<i64: 1, 4, 8, 8>}]} {
    %c0 = arith.constant 0 : index
    %c0_0 = arith.constant 0 : index
    %c0_1 = arith.constant 0 : index
    %0 = vector.load %arg2[%c0, %c0_0, %c0_1] : memref<1x8x32xbf16, #tpu.memory_space<vmem>>, vector<1x8x32xbf16>
    %1 = vector.shape_cast %0 : vector<1x8x32xbf16> to vector<8x32xbf16>
    %c0_2 = arith.constant 0 : index
    %c0_3 = arith.constant 0 : index
    %2 = vector.load %arg3[%c0_2, %c0_3] : memref<32x96xbf16, #tpu.memory_space<vmem>>, vector<32x96xbf16>
    %cst = arith.constant dense<0.000000e+00> : vector<8x96xf32>
    %3 = tpu.matmul %1, %2, %cst {dimension_numbers = #tpu.dot_dimension_numbers<[1], [0], [0], [1], [0, 0, 1, 1], [], []>} : vector<8x32xbf16>, vector<32x96xbf16>, vector<8x96xf32> -> vector<8x96xf32>
    %c0_4 = arith.constant 0 : index
    %c0_5 = arith.constant 0 : index
    %4 = vector.load %arg4[%c0_4, %c0_5] : memref<1x96xf32, #tpu.memory_space<vmem>>, vector<1x96xf32>
    %5 = vector.broadcast %4 : vector<1x96xf32> to vector<8x96xf32>
    %6 = arith.addf %3, %5 : vector<8x96xf32>
    %c0_6 = arith.constant 0 : index
    %c0_7 = arith.constant 0 : index
    %7 = vector.load %arg8[%c0_6, %c0_7] : memref<8x96xf32, #tpu.memory_space<vmem>>, vector<8x96xf32>
    tpu.vector_store %arg8[%c0_6, %c0_7], %6 {strides = array<i32>} : memref<8x96xf32, #tpu.memory_space<vmem>>, vector<8x96xf32>,
    %c0_8 = arith.constant 0 : index
    %c0_9 = arith.constant 0 : index
    %8 = vector.load %arg8[%c0_8, %c0_9] : memref<8x96xf32, #tpu.memory_space<vmem>>, vector<8x8xf32>
    %9 = arith.truncf %8 : vector<8x8xf32> to vector<8x8xbf16>
    %c0_10 = arith.constant 0 : index
    %c0_11 = arith.constant 0 : index
    %c0_12 = arith.constant 0 : index
    %c0_13 = arith.constant 0 : index
    %10 = vector.load %arg5[%c0_10, %c0_11, %c0_12, %c0_13] : memref<1x4x8x8xbf16, #tpu.memory_space<vmem>>, vector<1x1x8x8xbf16>
    %11 = vector.shape_cast %10 : vector<1x1x8x8xbf16> to vector<8x8xbf16>
    %12 = vector.shape_cast %9 : vector<8x8xbf16> to vector<1x1x8x8xbf16>
    tpu.vector_store %arg5[%c0_10, %c0_11, %c0_12, %c0_13], %12 {strides = array<i32>} : memref<1x4x8x8xbf16, #tpu.memory_space<vmem>>, vector<1x1x8x8xbf16>,
    %c0_14 = arith.constant 0 : index
    %c32 = arith.constant 32 : index
    %13 = vector.load %arg8[%c0_14, %c32] : memref<8x96xf32, #tpu.memory_space<vmem>>, vector<8x8xf32>
    %14 = arith.truncf %13 : vector<8x8xf32> to vector<8x8xbf16>
    %c0_15 = arith.constant 0 : index
    %c0_16 = arith.constant 0 : index
    %c0_17 = arith.constant 0 : index
    %c0_18 = arith.constant 0 : index
    %15 = vector.load %arg6[%c0_15, %c0_16, %c0_17, %c0_18] : memref<1x4x8x8xbf16, #tpu.memory_space<vmem>>, vector<1x1x8x8xbf16>
    %16 = vector.shape_cast %15 : vector<1x1x8x8xbf16> to vector<8x8xbf16>
    %17 = vector.shape_cast %14 : vector<8x8xbf16> to vector<1x1x8x8xbf16>
    tpu.vector_store %arg6[%c0_15, %c0_16, %c0_17, %c0_18], %17 {strides = array<i32>} : memref<1x4x8x8xbf16, #tpu.memory_space<vmem>>, vector<1x1x8x8xbf16>,
    %c0_19 = arith.constant 0 : index
    %c64 = arith.constant 64 : index
    %18 = vector.load %arg8[%c0_19, %c64] : memref<8x96xf32, #tpu.memory_space<vmem>>, vector<8x8xf32>
    %19 = arith.truncf %18 : vector<8x8xf32> to vector<8x8xbf16>
    %c0_20 = arith.constant 0 : index
    %c0_21 = arith.constant 0 : index
    %c0_22 = arith.constant 0 : index
    %c0_23 = arith.constant 0 : index
    %20 = vector.load %arg7[%c0_20, %c0_21, %c0_22, %c0_23] : memref<1x4x8x8xbf16, #tpu.memory_space<vmem>>, vector<1x1x8x8xbf16>
    %21 = vector.shape_cast %20 : vector<1x1x8x8xbf16> to vector<8x8xbf16>
    %22 = vector.shape_cast %19 : vector<8x8xbf16> to vector<1x1x8x8xbf16>
    tpu.vector_store %arg7[%c0_20, %c0_21, %c0_22, %c0_23], %22 {strides = array<i32>} : memref<1x4x8x8xbf16, #tpu.memory_space<vmem>>, vector<1x1x8x8xbf16>,
    %c0_24 = arith.constant 0 : index
    %c8 = arith.constant 8 : index
    %23 = vector.load %arg8[%c0_24, %c8] : memref<8x96xf32, #tpu.memory_space<vmem>>, vector<8x8xf32>
    %24 = arith.truncf %23 : vector<8x8xf32> to vector<8x8xbf16>
    %c0_25 = arith.constant 0 : index
    %c1 = arith.constant 1 : index
    %c0_26 = arith.constant 0 : index
    %c0_27 = arith.constant 0 : index
    %25 = vector.load %arg5[%c0_25, %c1, %c0_26, %c0_27] : memref<1x4x8x8xbf16, #tpu.memory_space<vmem>>, vector<1x1x8x8xbf16>
    %26 = vector.shape_cast %25 : vector<1x1x8x8xbf16> to vector<8x8xbf16>
    %27 = vector.shape_cast %24 : vector<8x8xbf16> to vector<1x1x8x8xbf16>
    tpu.vector_store %arg5[%c0_25, %c1, %c0_26, %c0_27], %27 {strides = array<i32>} : memref<1x4x8x8xbf16, #tpu.memory_space<vmem>>, vector<1x1x8x8xbf16>,
    %c0_28 = arith.constant 0 : index
    %c40 = arith.constant 40 : index
    %28 = vector.load %arg8[%c0_28, %c40] : memref<8x96xf32, #tpu.memory_space<vmem>>, vector<8x8xf32>
    %29 = arith.truncf %28 : vector<8x8xf32> to vector<8x8xbf16>
    %c0_29 = arith.constant 0 : index
    %c1_30 = arith.constant 1 : index
    %c0_31 = arith.constant 0 : index
    %c0_32 = arith.constant 0 : index
    %30 = vector.load %arg6[%c0_29, %c1_30, %c0_31, %c0_32] : memref<1x4x8x8xbf16, #tpu.memory_space<vmem>>, vector<1x1x8x8xbf16>
    %31 = vector.shape_cast %30 : vector<1x1x8x8xbf16> to vector<8x8xbf16>
    %32 = vector.shape_cast %29 : vector<8x8xbf16> to vector<1x1x8x8xbf16>
    tpu.vector_store %arg6[%c0_29, %c1_30, %c0_31, %c0_32], %32 {strides = array<i32>} : memref<1x4x8x8xbf16, #tpu.memory_space<vmem>>, vector<1x1x8x8xbf16>,
    %c0_33 = arith.constant 0 : index
    %c72 = arith.constant 72 : index
    %33 = vector.load %arg8[%c0_33, %c72] : memref<8x96xf32, #tpu.memory_space<vmem>>, vector<8x8xf32>
    %34 = arith.truncf %33 : vector<8x8xf32> to vector<8x8xbf16>
    %c0_34 = arith.constant 0 : index
    %c1_35 = arith.constant 1 : index
    %c0_36 = arith.constant 0 : index
    %c0_37 = arith.constant 0 : index
    %35 = vector.load %arg7[%c0_34, %c1_35, %c0_36, %c0_37] : memref<1x4x8x8xbf16, #tpu.memory_space<vmem>>, vector<1x1x8x8xbf16>
    %36 = vector.shape_cast %35 : vector<1x1x8x8xbf16> to vector<8x8xbf16>
    %37 = vector.shape_cast %34 : vector<8x8xbf16> to vector<1x1x8x8xbf16>
    tpu.vector_store %arg7[%c0_34, %c1_35, %c0_36, %c0_37], %37 {strides = array<i32>} : memref<1x4x8x8xbf16, #tpu.memory_space<vmem>>, vector<1x1x8x8xbf16>,
    %c0_38 = arith.constant 0 : index
    %c16 = arith.constant 16 : index
    %38 = vector.load %arg8[%c0_38, %c16] : memref<8x96xf32, #tpu.memory_space<vmem>>, vector<8x8xf32>
    %39 = arith.truncf %38 : vector<8x8xf32> to vector<8x8xbf16>
    %c0_39 = arith.constant 0 : index
    %c2 = arith.constant 2 : index
    %c0_40 = arith.constant 0 : index
    %c0_41 = arith.constant 0 : index
    %40 = vector.load %arg5[%c0_39, %c2, %c0_40, %c0_41] : memref<1x4x8x8xbf16, #tpu.memory_space<vmem>>, vector<1x1x8x8xbf16>
    %41 = vector.shape_cast %40 : vector<1x1x8x8xbf16> to vector<8x8xbf16>
    %42 = vector.shape_cast %39 : vector<8x8xbf16> to vector<1x1x8x8xbf16>
    tpu.vector_store %arg5[%c0_39, %c2, %c0_40, %c0_41], %42 {strides = array<i32>} : memref<1x4x8x8xbf16, #tpu.memory_space<vmem>>, vector<1x1x8x8xbf16>,
    %c0_42 = arith.constant 0 : index
    %c48 = arith.constant 48 : index
    %43 = vector.load %arg8[%c0_42, %c48] : memref<8x96xf32, #tpu.memory_space<vmem>>, vector<8x8xf32>
    %44 = arith.truncf %43 : vector<8x8xf32> to vector<8x8xbf16>
    %c0_43 = arith.constant 0 : index
    %c2_44 = arith.constant 2 : index
    %c0_45 = arith.constant 0 : index
    %c0_46 = arith.constant 0 : index
    %45 = vector.load %arg6[%c0_43, %c2_44, %c0_45, %c0_46] : memref<1x4x8x8xbf16, #tpu.memory_space<vmem>>, vector<1x1x8x8xbf16>
    %46 = vector.shape_cast %45 : vector<1x1x8x8xbf16> to vector<8x8xbf16>
    %47 = vector.shape_cast %44 : vector<8x8xbf16> to vector<1x1x8x8xbf16>
    tpu.vector_store %arg6[%c0_43, %c2_44, %c0_45, %c0_46], %47 {strides = array<i32>} : memref<1x4x8x8xbf16, #tpu.memory_space<vmem>>, vector<1x1x8x8xbf16>,
    %c0_47 = arith.constant 0 : index
    %c80 = arith.constant 80 : index
    %48 = vector.load %arg8[%c0_47, %c80] : memref<8x96xf32, #tpu.memory_space<vmem>>, vector<8x8xf32>
    %49 = arith.truncf %48 : vector<8x8xf32> to vector<8x8xbf16>
    %c0_48 = arith.constant 0 : index
    %c2_49 = arith.constant 2 : index
    %c0_50 = arith.constant 0 : index
    %c0_51 = arith.constant 0 : index
    %50 = vector.load %arg7[%c0_48, %c2_49, %c0_50, %c0_51] : memref<1x4x8x8xbf16, #tpu.memory_space<vmem>>, vector<1x1x8x8xbf16>
    %51 = vector.shape_cast %50 : vector<1x1x8x8xbf16> to vector<8x8xbf16>
    %52 = vector.shape_cast %49 : vector<8x8xbf16> to vector<1x1x8x8xbf16>
    tpu.vector_store %arg7[%c0_48, %c2_49, %c0_50, %c0_51], %52 {strides = array<i32>} : memref<1x4x8x8xbf16, #tpu.memory_space<vmem>>, vector<1x1x8x8xbf16>,
    %c0_52 = arith.constant 0 : index
    %c24 = arith.constant 24 : index
    %53 = vector.load %arg8[%c0_52, %c24] : memref<8x96xf32, #tpu.memory_space<vmem>>, vector<8x8xf32>
    %54 = arith.truncf %53 : vector<8x8xf32> to vector<8x8xbf16>
    %c0_53 = arith.constant 0 : index
    %c3 = arith.constant 3 : index
    %c0_54 = arith.constant 0 : index
    %c0_55 = arith.constant 0 : index
    %55 = vector.load %arg5[%c0_53, %c3, %c0_54, %c0_55] : memref<1x4x8x8xbf16, #tpu.memory_space<vmem>>, vector<1x1x8x8xbf16>
    %56 = vector.shape_cast %55 : vector<1x1x8x8xbf16> to vector<8x8xbf16>
    %57 = vector.shape_cast %54 : vector<8x8xbf16> to vector<1x1x8x8xbf16>
    tpu.vector_store %arg5[%c0_53, %c3, %c0_54, %c0_55], %57 {strides = array<i32>} : memref<1x4x8x8xbf16, #tpu.memory_space<vmem>>, vector<1x1x8x8xbf16>,
    %c0_56 = arith.constant 0 : index
    %c56 = arith.constant 56 : index
    %58 = vector.load %arg8[%c0_56, %c56] : memref<8x96xf32, #tpu.memory_space<vmem>>, vector<8x8xf32>
    %59 = arith.truncf %58 : vector<8x8xf32> to vector<8x8xbf16>
    %c0_57 = arith.constant 0 : index
    %c3_58 = arith.constant 3 : index
    %c0_59 = arith.constant 0 : index
    %c0_60 = arith.constant 0 : index
    %60 = vector.load %arg6[%c0_57, %c3_58, %c0_59, %c0_60] : memref<1x4x8x8xbf16, #tpu.memory_space<vmem>>, vector<1x1x8x8xbf16>
    %61 = vector.shape_cast %60 : vector<1x1x8x8xbf16> to vector<8x8xbf16>
    %62 = vector.shape_cast %59 : vector<8x8xbf16> to vector<1x1x8x8xbf16>
    tpu.vector_store %arg6[%c0_57, %c3_58, %c0_59, %c0_60], %62 {strides = array<i32>} : memref<1x4x8x8xbf16, #tpu.memory_space<vmem>>, vector<1x1x8x8xbf16>,
    %c0_61 = arith.constant 0 : index
    %c88 = arith.constant 88 : index
    %63 = vector.load %arg8[%c0_61, %c88] : memref<8x96xf32, #tpu.memory_space<vmem>>, vector<8x8xf32>
    %64 = arith.truncf %63 : vector<8x8xf32> to vector<8x8xbf16>
    %c0_62 = arith.constant 0 : index
    %c3_63 = arith.constant 3 : index
    %c0_64 = arith.constant 0 : index
    %c0_65 = arith.constant 0 : index
    %65 = vector.load %arg7[%c0_62, %c3_63, %c0_64, %c0_65] : memref<1x4x8x8xbf16, #tpu.memory_space<vmem>>, vector<1x1x8x8xbf16>
    %66 = vector.shape_cast %65 : vector<1x1x8x8xbf16> to vector<8x8xbf16>
    %67 = vector.shape_cast %64 : vector<8x8xbf16> to vector<1x1x8x8xbf16>
    tpu.vector_store %arg7[%c0_62, %c3_63, %c0_64, %c0_65], %67 {strides = array<i32>} : memref<1x4x8x8xbf16, #tpu.memory_space<vmem>>, vector<1x1x8x8xbf16>,
    return
  }
  func.func @transform_0(%arg0: i32, %arg1: i32) -> (i32, i32, i32) {
    %c0_i32 = arith.constant 0 : i32
    %c0_i32_0 = arith.constant 0 : i32
    return %arg0, %arg1, %c0_i32 : i32, i32, i32
  }
  func.func @transform_1(%arg0: i32, %arg1: i32) -> (i32, i32) {
    %c0_i32 = arith.constant 0 : i32
    %c0_i32_0 = arith.constant 0 : i32
    %c0_i32_1 = arith.constant 0 : i32
    return %c0_i32, %c0_i32_0 : i32, i32
  }
  func.func @transform_2(%arg0: i32, %arg1: i32) -> (i32, i32) {
    %c0_i32 = arith.constant 0 : i32
    %c0_i32_0 = arith.constant 0 : i32
    %c0_i32_1 = arith.constant 0 : i32
    return %c0_i32, %c0_i32_0 : i32, i32
  }
  func.func @transform_3(%arg0: i32, %arg1: i32) -> (i32, i32, i32, i32) {
    %c0_i32 = arith.constant 0 : i32
    %c0_i32_0 = arith.constant 0 : i32
    %c0_i32_1 = arith.constant 0 : i32
    return %arg0, %c0_i32, %arg1, %c0_i32_0 : i32, i32, i32, i32
  }
  func.func @transform_4(%arg0: i32, %arg1: i32) -> (i32, i32, i32, i32) {
    %c0_i32 = arith.constant 0 : i32
    %c0_i32_0 = arith.constant 0 : i32
    %c0_i32_1 = arith.constant 0 : i32
    return %arg0, %c0_i32, %arg1, %c0_i32_0 : i32, i32, i32, i32
  }
  func.func @transform_5(%arg0: i32, %arg1: i32) -> (i32, i32, i32, i32) {
    %c0_i32 = arith.constant 0 : i32
    %c0_i32_0 = arith.constant 0 : i32
    %c0_i32_1 = arith.constant 0 : i32
    return %arg0, %c0_i32, %arg1, %c0_i32_0 : i32, i32, i32, i32
  }
}

module attributes {stable_mosaic.version = 11 : i64} {
  func.func @qkv_proj_kernel(%arg0: i32, %arg1: i32, %arg2: memref<1x8x32xbf16, #tpu.memory_space<vmem>>, %arg3: memref<32x96xbf16, #tpu.memory_space<vmem>>, %arg4: memref<1x96xf32, #tpu.memory_space<vmem>>, %arg5: memref<1x4x8x8xbf16, #tpu.memory_space<vmem>>, %arg6: memref<1x4x8x8xbf16, #tpu.memory_space<vmem>>, %arg7: memref<1x4x8x8xbf16, #tpu.memory_space<vmem>>, %arg8: memref<8x96xf32, #tpu.memory_space<vmem>>) attributes {dimension_semantics = [#tpu.dimension_semantics<parallel>, #tpu.dimension_semantics<parallel>], iteration_bounds = array<i64: 2, 1>, scalar_prefetch = 0 : i64, scratch_operands = 1 : i64, tpu.core_type = #tpu.core_type<tc>, window_params = [{transform_indices = @transform_0, window_bounds = array<i64: 1, 8, 32>}, {pipeline_mode = #tpu.pipeline_mode<synchronous>, transform_indices = @transform_1, window_bounds = array<i64: 32, 96>}, {pipeline_mode = #tpu.pipeline_mode<synchronous>, transform_indices = @transform_2, window_bounds = array<i64: 1, 96>}, {transform_indices = @transform_3, window_bounds = array<i64: 1, 4, 8, 8>}, {transform_indices = @transform_4, window_bounds = array<i64: 1, 4, 8, 8>}, {transform_indices = @transform_5, window_bounds = array<i64: 1, 4, 8, 8>}]} {
    %c0 = arith.constant 0 : index
    %c0_0 = arith.constant 0 : index
    %c0_1 = arith.constant 0 : index
    %0 = vector.load %arg2[%c0, %c0_0, %c0_1] : memref<1x8x32xbf16, #tpu.memory_space<vmem>>, vector<1x8x32xbf16>
    %1 = vector.shape_cast %0 : vector<1x8x32xbf16> to vector<8x32xbf16>
    %c0_2 = arith.constant 0 : index
    %c0_3 = arith.constant 0 : index
    %2 = vector.load %arg3[%c0_2, %c0_3] : memref<32x96xbf16, #tpu.memory_space<vmem>>, vector<32x96xbf16>
    %cst = arith.constant dense<0.000000e+00> : vector<8x96xf32>
    %3 = tpu.matmul %1, %2, %cst {dimension_numbers = #tpu.dot_dimension_numbers<[1], [0], [0], [1], [0, 0, 1, 1], [], []>} : vector<8x32xbf16>, vector<32x96xbf16>, vector<8x96xf32> -> vector<8x96xf32>
    %c0_4 = arith.constant 0 : index
    %c0_5 = arith.constant 0 : index
    %4 = vector.load %arg4[%c0_4, %c0_5] : memref<1x96xf32, #tpu.memory_space<vmem>>, vector<1x96xf32>
    %5 = vector.broadcast %4 : vector<1x96xf32> to vector<8x96xf32>
    %6 = arith.addf %3, %5 : vector<8x96xf32>
    %c0_6 = arith.constant 0 : index
    %c0_7 = arith.constant 0 : index
    %7 = vector.load %arg8[%c0_6, %c0_7] : memref<8x96xf32, #tpu.memory_space<vmem>>, vector<8x96xf32>
    tpu.vector_store %arg8[%c0_6, %c0_7], %6 {strides = array<i32>} : memref<8x96xf32, #tpu.memory_space<vmem>>, vector<8x96xf32>,
    %c0_8 = arith.constant 0 : index
    %c0_9 = arith.constant 0 : index
    %8 = vector.load %arg8[%c0_8, %c0_9] : memref<8x96xf32, #tpu.memory_space<vmem>>, vector<8x8xf32>
    %9 = arith.truncf %8 : vector<8x8xf32> to vector<8x8xbf16>
    %c0_10 = arith.constant 0 : index
    %c0_11 = arith.constant 0 : index
    %c0_12 = arith.constant 0 : index
    %c0_13 = arith.constant 0 : index
    %10 = vector.load %arg5[%c0_10, %c0_11, %c0_12, %c0_13] : memref<1x4x8x8xbf16, #tpu.memory_space<vmem>>, vector<1x1x8x8xbf16>
    %11 = vector.shape_cast %10 : vector<1x1x8x8xbf16> to vector<8x8xbf16>
    %12 = vector.shape_cast %9 : vector<8x8xbf16> to vector<1x1x8x8xbf16>
    tpu.vector_store %arg5[%c0_10, %c0_11, %c0_12, %c0_13], %12 {strides = array<i32>} : memref<1x4x8x8xbf16, #tpu.memory_space<vmem>>, vector<1x1x8x8xbf16>,
    %c0_14 = arith.constant 0 : index
    %c32 = arith.constant 32 : index
    %13 = vector.load %arg8[%c0_14, %c32] : memref<8x96xf32, #tpu.memory_space<vmem>>, vector<8x8xf32>
    %14 = arith.truncf %13 : vector<8x8xf32> to vector<8x8xbf16>
    %c0_15 = arith.constant 0 : index
    %c0_16 = arith.constant 0 : index
    %c0_17 = arith.constant 0 : index
    %c0_18 = arith.constant 0 : index
    %15 = vector.load %arg6[%c0_15, %c0_16, %c0_17, %c0_18] : memref<1x4x8x8xbf16, #tpu.memory_space<vmem>>, vector<1x1x8x8xbf16>
    %16 = vector.shape_cast %15 : vector<1x1x8x8xbf16> to vector<8x8xbf16>
    %17 = vector.shape_cast %14 : vector<8x8xbf16> to vector<1x1x8x8xbf16>
    tpu.vector_store %arg6[%c0_15, %c0_16, %c0_17, %c0_18], %17 {strides = array<i32>} : memref<1x4x8x8xbf16, #tpu.memory_space<vmem>>, vector<1x1x8x8xbf16>,
    %c0_19 = arith.constant 0 : index
    %c64 = arith.constant 64 : index
    %18 = vector.load %arg8[%c0_19, %c64] : memref<8x96xf32, #tpu.memory_space<vmem>>, vector<8x8xf32>
    %19 = arith.truncf %18 : vector<8x8xf32> to vector<8x8xbf16>
    %c0_20 = arith.constant 0 : index
    %c0_21 = arith.constant 0 : index
    %c0_22 = arith.constant 0 : index
    %c0_23 = arith.constant 0 : index
    %20 = vector.load %arg7[%c0_20, %c0_21, %c0_22, %c0_23] : memref<1x4x8x8xbf16, #tpu.memory_space<vmem>>, vector<1x1x8x8xbf16>
    %21 = vector.shape_cast %20 : vector<1x1x8x8xbf16> to vector<8x8xbf16>
    %22 = vector.shape_cast %19 : vector<8x8xbf16> to vector<1x1x8x8xbf16>
    tpu.vector_store %arg7[%c0_20, %c0_21, %c0_22, %c0_23], %22 {strides = array<i32>} : memref<1x4x8x8xbf16, #tpu.memory_space<vmem>>, vector<1x1x8x8xbf16>,
    %c0_24 = arith.constant 0 : index
    %c8 = arith.constant 8 : index
    %23 = vector.load %arg8[%c0_24, %c8] : memref<8x96xf32, #tpu.memory_space<vmem>>, vector<8x8xf32>
    %24 = arith.truncf %23 : vector<8x8xf32> to vector<8x8xbf16>
    %c0_25 = arith.constant 0 : index
    %c1 = arith.constant 1 : index
    %c0_26 = arith.constant 0 : index
    %c0_27 = arith.constant 0 : index
    %25 = vector.load %arg5[%c0_25, %c1, %c0_26, %c0_27] : memref<1x4x8x8xbf16, #tpu.memory_space<vmem>>, vector<1x1x8x8xbf16>
    %26 = vector.shape_cast %25 : vector<1x1x8x8xbf16> to vector<8x8xbf16>
    %27 = vector.shape_cast %24 : vector<8x8xbf16> to vector<1x1x8x8xbf16>
    tpu.vector_store %arg5[%c0_25, %c1, %c0_26, %c0_27], %27 {strides = array<i32>} : memref<1x4x8x8xbf16, #tpu.memory_space<vmem>>, vector<1x1x8x8xbf16>,
    %c0_28 = arith.constant 0 : index
    %c40 = arith.constant 40 : index
    %28 = vector.load %arg8[%c0_28, %c40] : memref<8x96xf32, #tpu.memory_space<vmem>>, vector<8x8xf32>
    %29 = arith.truncf %28 : vector<8x8xf32> to vector<8x8xbf16>
    %c0_29 = arith.constant 0 : index
    %c1_30 = arith.constant 1 : index
    %c0_31 = arith.constant 0 : index
    %c0_32 = arith.constant 0 : index
    %30 = vector.load %arg6[%c0_29, %c1_30, %c0_31, %c0_32] : memref<1x4x8x8xbf16, #tpu.memory_space<vmem>>, vector<1x1x8x8xbf16>
    %31 = vector.shape_cast %30 : vector<1x1x8x8xbf16> to vector<8x8xbf16>
    %32 = vector.shape_cast %29 : vector<8x8xbf16> to vector<1x1x8x8xbf16>
    tpu.vector_store %arg6[%c0_29, %c1_30, %c0_31, %c0_32], %32 {strides = array<i32>} : memref<1x4x8x8xbf16, #tpu.memory_space<vmem>>, vector<1x1x8x8xbf16>,
    %c0_33 = arith.constant 0 : index
    %c72 = arith.constant 72 : index
    %33 = vector.load %arg8[%c0_33, %c72] : memref<8x96xf32, #tpu.memory_space<vmem>>, vector<8x8xf32>
    %34 = arith.truncf %33 : vector<8x8xf32> to vector<8x8xbf16>
    %c0_34 = arith.constant 0 : index
    %c1_35 = arith.constant 1 : index
    %c0_36 = arith.constant 0 : index
    %c0_37 = arith.constant 0 : index
    %35 = vector.load %arg7[%c0_34, %c1_35, %c0_36, %c0_37] : memref<1x4x8x8xbf16, #tpu.memory_space<vmem>>, vector<1x1x8x8xbf16>
    %36 = vector.shape_cast %35 : vector<1x1x8x8xbf16> to vector<8x8xbf16>
    %37 = vector.shape_cast %34 : vector<8x8xbf16> to vector<1x1x8x8xbf16>
    tpu.vector_store %arg7[%c0_34, %c1_35, %c0_36, %c0_37], %37 {strides = array<i32>} : memref<1x4x8x8xbf16, #tpu.memory_space<vmem>>, vector<1x1x8x8xbf16>,
    %c0_38 = arith.constant 0 : index
    %c16 = arith.constant 16 : index
    %38 = vector.load %arg8[%c0_38, %c16] : memref<8x96xf32, #tpu.memory_space<vmem>>, vector<8x8xf32>
    %39 = arith.truncf %38 : vector<8x8xf32> to vector<8x8xbf16>
    %c0_39 = arith.constant 0 : index
    %c2 = arith.constant 2 : index
    %c0_40 = arith.constant 0 : index
    %c0_41 = arith.constant 0 : index
    %40 = vector.load %arg5[%c0_39, %c2, %c0_40, %c0_41] : memref<1x4x8x8xbf16, #tpu.memory_space<vmem>>, vector<1x1x8x8xbf16>
    %41 = vector.shape_cast %40 : vector<1x1x8x8xbf16> to vector<8x8xbf16>
    %42 = vector.shape_cast %39 : vector<8x8xbf16> to vector<1x1x8x8xbf16>
    tpu.vector_store %arg5[%c0_39, %c2, %c0_40, %c0_41], %42 {strides = array<i32>} : memref<1x4x8x8xbf16, #tpu.memory_space<vmem>>, vector<1x1x8x8xbf16>,
    %c0_42 = arith.constant 0 : index
    %c48 = arith.constant 48 : index
    %43 = vector.load %arg8[%c0_42, %c48] : memref<8x96xf32, #tpu.memory_space<vmem>>, vector<8x8xf32>
    %44 = arith.truncf %43 : vector<8x8xf32> to vector<8x8xbf16>
    %c0_43 = arith.constant 0 : index
    %c2_44 = arith.constant 2 : index
    %c0_45 = arith.constant 0 : index
    %c0_46 = arith.constant 0 : index
    %45 = vector.load %arg6[%c0_43, %c2_44, %c0_45, %c0_46] : memref<1x4x8x8xbf16, #tpu.memory_space<vmem>>, vector<1x1x8x8xbf16>
    %46 = vector.shape_cast %45 : vector<1x1x8x8xbf16> to vector<8x8xbf16>
    %47 = vector.shape_cast %44 : vector<8x8xbf16> to vector<1x1x8x8xbf16>
    tpu.vector_store %arg6[%c0_43, %c2_44, %c0_45, %c0_46], %47 {strides = array<i32>} : memref<1x4x8x8xbf16, #tpu.memory_space<vmem>>, vector<1x1x8x8xbf16>,
    %c0_47 = arith.constant 0 : index
    %c80 = arith.constant 80 : index
    %48 = vector.load %arg8[%c0_47, %c80] : memref<8x96xf32, #tpu.memory_space<vmem>>, vector<8x8xf32>
    %49 = arith.truncf %48 : vector<8x8xf32> to vector<8x8xbf16>
    %c0_48 = arith.constant 0 : index
    %c2_49 = arith.constant 2 : index
    %c0_50 = arith.constant 0 : index
    %c0_51 = arith.constant 0 : index
    %50 = vector.load %arg7[%c0_48, %c2_49, %c0_50, %c0_51] : memref<1x4x8x8xbf16, #tpu.memory_space<vmem>>, vector<1x1x8x8xbf16>
    %51 = vector.shape_cast %50 : vector<1x1x8x8xbf16> to vector<8x8xbf16>
    %52 = vector.shape_cast %49 : vector<8x8xbf16> to vector<1x1x8x8xbf16>
    tpu.vector_store %arg7[%c0_48, %c2_49, %c0_50, %c0_51], %52 {strides = array<i32>} : memref<1x4x8x8xbf16, #tpu.memory_space<vmem>>, vector<1x1x8x8xbf16>,
    %c0_52 = arith.constant 0 : index
    %c24 = arith.constant 24 : index
    %53 = vector.load %arg8[%c0_52, %c24] : memref<8x96xf32, #tpu.memory_space<vmem>>, vector<8x8xf32>
    %54 = arith.truncf %53 : vector<8x8xf32> to vector<8x8xbf16>
    %c0_53 = arith.constant 0 : index
    %c3 = arith.constant 3 : index
    %c0_54 = arith.constant 0 : index
    %c0_55 = arith.constant 0 : index
    %55 = vector.load %arg5[%c0_53, %c3, %c0_54, %c0_55] : memref<1x4x8x8xbf16, #tpu.memory_space<vmem>>, vector<1x1x8x8xbf16>
    %56 = vector.shape_cast %55 : vector<1x1x8x8xbf16> to vector<8x8xbf16>
    %57 = vector.shape_cast %54 : vector<8x8xbf16> to vector<1x1x8x8xbf16>
    tpu.vector_store %arg5[%c0_53, %c3, %c0_54, %c0_55], %57 {strides = array<i32>} : memref<1x4x8x8xbf16, #tpu.memory_space<vmem>>, vector<1x1x8x8xbf16>,
    %c0_56 = arith.constant 0 : index
    %c56 = arith.constant 56 : index
    %58 = vector.load %arg8[%c0_56, %c56] : memref<8x96xf32, #tpu.memory_space<vmem>>, vector<8x8xf32>
    %59 = arith.truncf %58 : vector<8x8xf32> to vector<8x8xbf16>
    %c0_57 = arith.constant 0 : index
    %c3_58 = arith.constant 3 : index
    %c0_59 = arith.constant 0 : index
    %c0_60 = arith.constant 0 : index
    %60 = vector.load %arg6[%c0_57, %c3_58, %c0_59, %c0_60] : memref<1x4x8x8xbf16, #tpu.memory_space<vmem>>, vector<1x1x8x8xbf16>
    %61 = vector.shape_cast %60 : vector<1x1x8x8xbf16> to vector<8x8xbf16>
    %62 = vector.shape_cast %59 : vector<8x8xbf16> to vector<1x1x8x8xbf16>
    tpu.vector_store %arg6[%c0_57, %c3_58, %c0_59, %c0_60], %62 {strides = array<i32>} : memref<1x4x8x8xbf16, #tpu.memory_space<vmem>>, vector<1x1x8x8xbf16>,
    %c0_61 = arith.constant 0 : index
    %c88 = arith.constant 88 : index
    %63 = vector.load %arg8[%c0_61, %c88] : memref<8x96xf32, #tpu.memory_space<vmem>>, vector<8x8xf32>
    %64 = arith.truncf %63 : vector<8x8xf32> to vector<8x8xbf16>
    %c0_62 = arith.constant 0 : index
    %c3_63 = arith.constant 3 : index
    %c0_64 = arith.constant 0 : index
    %c0_65 = arith.constant 0 : index
    %65 = vector.load %arg7[%c0_62, %c3_63, %c0_64, %c0_65] : memref<1x4x8x8xbf16, #tpu.memory_space<vmem>>, vector<1x1x8x8xbf16>
    %66 = vector.shape_cast %65 : vector<1x1x8x8xbf16> to vector<8x8xbf16>
    %67 = vector.shape_cast %64 : vector<8x8xbf16> to vector<1x1x8x8xbf16>
    tpu.vector_store %arg7[%c0_62, %c3_63, %c0_64, %c0_65], %67 {strides = array<i32>} : memref<1x4x8x8xbf16, #tpu.memory_space<vmem>>, vector<1x1x8x8xbf16>,
    return
  }
  func.func @transform_0(%arg0: i32, %arg1: i32) -> (i32, i32, i32) {
    %c0_i32 = arith.constant 0 : i32
    %c0_i32_0 = arith.constant 0 : i32
    return %arg0, %arg1, %c0_i32 : i32, i32, i32
  }
  func.func @transform_1(%arg0: i32, %arg1: i32) -> (i32, i32) {
    %c0_i32 = arith.constant 0 : i32
    %c0_i32_0 = arith.constant 0 : i32
    %c0_i32_1 = arith.constant 0 : i32
    return %c0_i32, %c0_i32_0 : i32, i32
  }
  func.func @transform_2(%arg0: i32, %arg1: i32) -> (i32, i32) {
    %c0_i32 = arith.constant 0 : i32
    %c0_i32_0 = arith.constant 0 : i32
    %c0_i32_1 = arith.constant 0 : i32
    return %c0_i32, %c0_i32_0 : i32, i32
  }
  func.func @transform_3(%arg0: i32, %arg1: i32) -> (i32, i32, i32, i32) {
    %c0_i32 = arith.constant 0 : i32
    %c0_i32_0 = arith.constant 0 : i32
    %c0_i32_1 = arith.constant 0 : i32
    return %arg0, %c0_i32, %arg1, %c0_i32_0 : i32, i32, i32, i32
  }
  func.func @transform_4(%arg0: i32, %arg1: i32) -> (i32, i32, i32, i32) {
    %c0_i32 = arith.constant 0 : i32
    %c0_i32_0 = arith.constant 0 : i32
    %c0_i32_1 = arith.constant 0 : i32
    return %arg0, %c0_i32, %arg1, %c0_i32_0 : i32, i32, i32, i32
  }
  func.func @transform_5(%arg0: i32, %arg1: i32) -> (i32, i32, i32, i32) {
    %c0_i32 = arith.constant 0 : i32
    %c0_i32_0 = arith.constant 0 : i32
    %c0_i32_1 = arith.constant 0 : i32
    return %arg0, %c0_i32, %arg1, %c0_i32_0 : i32, i32, i32, i32
  }
}

</mosaic_0001>

<bundles_post_ra>
// kernel: tpu_custom_call.1
= control target key start
LH: loop header
LB: loop body
LE: loop exit
PB: predicated region body
PF: predicated region fallthrough
CT: control target
= control target key end

     0   :  { %s1292_s0 = inlined_call_operand.hbm [shape: bf16[2,8,32], index: 0, kind: input, shape index: {}]   ;;  %s1293_s1 = inlined_call_operand.hbm [shape: bf16[32,96], index: 1, kind: input, shape index: {}]   ;;  %s1294_s2 = inlined_call_operand.vmem [shape: f32[1,96], index: 2, kind: input, shape index: {}]   ;;  %s1295_s3 = inlined_call_operand.hbm [shape: bf16[2,4,8,8], index: 3, kind: output, shape index: {0}]   ;;  %s1296_s4 = inlined_call_operand.hbm [shape: bf16[2,4,8,8], index: 4, kind: output, shape index: {1}]   ;;  %s1297_s5 = inlined_call_operand.hbm [shape: bf16[2,4,8,8], index: 5, kind: output, shape index: {2}]  }
   0x1   :  { %1303 = sst [smem:[#allocation16_spill]] %s1292_s0 }
   0x2   :  { %11 = vsyncpa [#allocation4], 0 }
   0x3   :  { %13 = vsyncpa [#allocation4 + $0x1], 0 }
   0x4   :  { %14 = vsyncpa [#allocation7], 0 }
   0x5   :  { %15 = vsyncpa [#allocation5], 0 }
   0x6   :  { %17 = vsyncpa [#allocation5 + $0x1], 0 }
   0x7   :  { %18 = vsyncpa [#allocation10], 0 }
   0x8   :  { %20 = vsyncpa [#allocation10 + $0x1], 0  ;;  %s1051_s18 = smov 0   ;;  %s1053_s19 = smov 0  }
   0x9   :  { %s1055_s20 = smov 0   ;;  %s1057_s21 = smov 0  }
   0xa   :  { %s1059_s22 = smov 0   ;;  %s1061_s23 = smov 0  }
   0xb LB: > { %s1082_s24 = sadd.s32 4294967295, %s1004_s23   ;;  %p655_p0 = scmp.ge.s32.totalorder %s1004_s23, 1  ;;  %s1004_s23 = sphi %s1061_s23, %s26_s23   ;;  %s1000_s22 = sphi %s1059_s22, %s1317_s22   ;;  %s996_s21 = sphi %s1057_s21, %s1316_s21   ;;  %s992_s20 = sphi %s1055_s20, %s1315_s20   ;;  %s988_s19 = sphi %s1053_s19, %s1314_s19   ;;  %s984_s18 = sphi %s1051_s18, %s1313_s18  }
   0xc   : > { %p61_p1 = scmp.eq.s32.totalorder %s1082_s24, 0  ;;  %p197_p2 = scmp.lt.s32.totalorder %s1004_s23, 3 }
   0xd   : > { %s208_s27 = sshll.u32 %s1293_s1, 4  ;;  %s1006_s29 = smov [#allocation6]   ;;  %s209_s27 = int_to_ptr.hbm [resolvable:$true] %s208_s27 }
   0xe   : > { %p1090_p3 = pnand %p655_p0, %p197_p2  ;;  %s210_s30 = sshll.u32 %s1006_s29, 4  ;;  %s211_s30 = int_to_ptr.vmem [resolvable:$true] %s210_s30 }
   0xf   : > { %p657_p6 = scmp.ge.s32.totalorder %s1004_s23, 2  ;;  %s1007_s6 = smov 64  }
  0x10   : > { %p712_p4 = pneg %p1090_p3  ;;  %s1008_s7 = smov 4  }
  0x11   : > { %s1298_s8 = sadd.s32 4294967294, %s1004_s23   ;;  %s38_s9 = sadd.s32 1, %s1000_s22 }
  0x12   : > { %p713_p5 = pnand %p712_p4, %p61_p1  ;;  %s47_s10 = sadd.s32 1, %s992_s20 }
  0x13   : > { %p40_p7 = scmp.ge.s32.totalorder %s38_s9, 2  ;;  %p54_p8 = scmp.ne.s32.totalorder %s992_s20, %s988_s19 }
  0x14   : > { %715 = dma.hbm_to_vmem [thread:$0]  (!%p713_p5), %s209_s27, 256, %s211_s30, [#allocation7], %s1007_s6, %s1007_s6, %s1008_s7  }
  0x15   : > { %p55_p9 = scmp.eq.s32.totalorder %s1004_s23, 0  ;;  %p60_p10 = scmp.ne.s32.totalorder %s988_s19, %s984_s18 }
  0x16   : > { %s1319_s9 = smov (%p40_p7, %s38_s9), 0  ;;  %p128_p13 = scmp.eq.s32.totalorder %s1082_s24, 1 }
  0x17   : > { %p1109_p11 = por %p55_p9, %p54_p8  ;;  %p1115_p12 = por %p61_p1, %p60_p10 }
  0x18   : > { %s42_s13 = ssub.s32 %s1000_s22, %s1319_s9  ;;  %p134_p2 = scmp.eq.s32.totalorder %s1298_s8, 1 }
  0x19   : > { %p45_p0 = scmp.eq.s32.totalorder %s42_s13, 0  ;;  %p1124_p4 = por %p128_p13, %p54_p8 }
  0x1a   : > { %p731_p5 = scmp.lt.s32.totalorder %s1004_s23, 2  ;;  %p1132_p7 = por %p134_p2, %p60_p10 }
  0x1b   : > { %s1130_s15 = scalar_select %p45_p0, %s992_s20, %s47_s10  }
  0x1c   : > { %s227_s17 = sand.u32 1, %s992_s20   ;;  %s659_s26 = sshll.u32 %s1000_s22, 2 }
  0x1d   : > { %s658_s25 = sshll.u32 %s227_s17, 2  ;;  %s1309_s0 = sld [smem:[#allocation16_spill]] }
  0x1e   : > { %s231_s6 = scalar_lea.vmem [#allocation3], %s658_s25  ;;  %p717_p8 = pnand %p731_p5, %p1109_p11 }
  0x1f   : > { %s240_s7 = sshll.u32 %s231_s6, 4  ;;  %s228_s10 = scalar_lea.sflag [#allocation4], %s227_s17  ;;  %s241_s7 = int_to_ptr.vmem [resolvable:$true] %s240_s7 }
  0x20   : > { %s1146_s8 = sand.u32 (!%p1090_p3), 1, %s988_s19  }
  0x21   : > { %249 = sbr.rel (%p1090_p3) target bundleno = 342 (0x156), region = 32  ;;  %s661_s27 = sshll.u32 (!%p1090_p3), %s1146_s8, 2 }
  0x22   : > { %s255_s25 = scalar_lea.vmem (!%p1090_p3), [#allocation3], %s661_s27 }
  0x23   : > { %s236_s30 = scalar_lea.hbm %s1309_s0, %s659_s26  ;;  %s252_s26 = scalar_lea.sflag (!%p1090_p3), [#allocation4], %s1146_s8 }
  0x24   : > { %s238_s13 = sshll.u32 %s236_s30, 4  ;;  %s239_s13 = int_to_ptr.hbm [resolvable:$true] %s238_s13 }
  0x25   : > { %719 = dma.hbm_to_vmem [thread:$0]  (!%p717_p8), %s239_s13, 64, %s241_s7, %s228_s10  }
  0x26   : > { %967 = dma.done.wait (%p1115_p12), %s252_s26, 64  }
  0x27   : > { %969 = vsyncadd (%p1115_p12), %s252_s26, 4294967232 }
  0x28   : > { %971 = dma.done.wait (%p61_p1), [#allocation7], 256  }
  0x29   : > { %973 = vsyncadd (%p61_p1), [#allocation7], 4294967040  ;;  %v696_v0 = vld [vmem:[#allocation6 + $0x8] sm:$0xff]  ;;  %v695_v1 = vld [vmem:[#allocation6] sm:$0xff]  ;;  %vm320_vm0 = vcmask 261120   ;;  %vm337_vm1 = vcmask 785408  }
  0x2a   : > { %330 = vmatpush.bf16.msra.mxu0 %v696_v0  ;;  %v299_v2 = vld [vmem:[%s255_s25] sm:$0xf]  ;;  %v797_v3 = vld [vmem:[%s1294_s2] ss:$0 sm:$0xff]  ;;  %s1162_s12 = sshll.u32 %s1146_s8, 4  ;;  %vm341_vm2 = vcmask 60416  }
  0x2b   : > { %s1009_s17 = smov 80   ;;  %s1299_s29 = smov 64  }
  0x2c   : > { %s1166_s30 = scalar_lea.vmem [#allocation8], %s1162_s12  ;;  %s1011_s6 = smov 96  }
  0x2d   : > { %s1012_s7 = smov 72   ;;  %s1013_s13 = smov 120  }
  0x2e   : > { %331 = vmatpush.bf16.msra.mxu0 %v695_v1  ;;  %s1014_s10 = smov 88   ;;  %s1015_s27 = smov 112  }
  0x2f   : > { %s1016_s26 = smov 48   ;;  %s1017_s25 = smov 56  }
  0x30   : > { %s1018_s28 = smov 40   ;;  %s1019_s11 = smov 104  }
  0x31   : > { %674 = vmatmul.msk.bf16.vlgmr.msra.gmra.mxu0 %vm320_vm0, %v299_v2 }
  0xae   : > { %v333_v4 = vpop.f32.mrf.mxu0 }
  0xaf   : > { %v334_v5 = vadd.f32 %v797_v3, %v333_v4 }
  0xb1   : > { %338 = vst.msk [vmem:[#allocation2] sm:$0xff] %vm337_vm1, %v334_v5 }
  0xb6   : > { %v335_v6 = vpop.f32.mrf.mxu0 }
  0xb8   : > { %v389_v7 = vld [vmem:[#allocation2] sm:$0xff] }
  0xb9   : > { %v390_v8 = vpack.c.bf16 %v389_v7, %v389_v7 }
  0xbb   : > { %392 = vrot.lane.b32.xlu1 %v390_v8, %s1009_s17  ;;  %353 = vrot.lane.b32.xlu2 %v390_v8, %s1299_s29  ;;  %342 = vst.msk [vmem:[%s1166_s30] sm:$0xf] %vm341_vm2, %v390_v8  ;;  %s1171_s17 = scalar_lea.vmem [#allocation11], %s1162_s12 }
  0xbc   : > { %346 = vrot.lane.b32.xlu0 %v390_v8, %s1011_s6  ;;  %s1180_s6 = sshll.u32 %s996_s21, 4 }
  0xc3   : > { %416 = vrot.lane.b32.xlu1 %v390_v8, %s1012_s7  ;;  %360 = vrot.lane.b32.xlu2 %v390_v8, %s1013_s13  ;;  %s290_s7 = scalar_lea.vmem [#allocation9], %s1162_s12 }
  0xc4   : > { %368 = vrot.lane.b32.xlu0 %v390_v8, %s1014_s10  ;;  %s878_s10 = scalar_lea.hbm %s1296_s4, 32 }
  0xcb   : > { %384 = vrot.lane.b32.xlu1 %v390_v8, %s1015_s27  ;;  %400 = vrot.lane.b32.xlu2 %v390_v8, %s1016_s26  ;;  %s470_s27 = scalar_lea.hbm %s1296_s4, %s1180_s6  ;;  %s471_s26 = sshll.u32 %s290_s7, 4  ;;  %s472_s26 = int_to_ptr.vmem [resolvable:$true] %s471_s26 }
  0xcc   : > { %376 = vrot.lane.b32.xlu0 %v390_v8, %s1017_s25  ;;  %s434_s25 = sand.u32 1, %s1082_s24  }
  0xcd   : > { %s1192_s21 = scalar_lea.sflag [#allocation10], %s434_s25 }
  0xd3   : > { %424 = vrot.lane.b32.xlu1 %v390_v8, %s1018_s28  ;;  %s473_s28 = sshll.u32 %s470_s27, 4  ;;  %s474_s28 = int_to_ptr.hbm [resolvable:$true] %s473_s28 }
  0xd4   : > { %408 = vrot.lane.b32.xlu0 %v390_v8, %s1019_s11  ;;  %s872_s12 = sshra.s32 %s474_s28, 4  ;;  %s873_s12 = int_to_ptr.hbm [resolvable:$true] %s872_s12 }
  0xd5   : > { %s874_s11 = scalar_lea.hbm %s873_s12, 16  ;;  %p879_p10 = scmp.lt.s32.totalorder %s873_s12, %s1296_s4 }
  0xd6   : > { %p875_p1 = scmp.ne.s32.totalorder %s873_s12, %s874_s11  ;;  %p880_p11 = scmp.lt.s32.totalorder %s878_s10, %s874_s11 }
  0xd8   : > { %p876_p3 = pnand %p875_p1, %p1124_p4  ;;  %p881_p12 = por %p880_p11, %p879_p10 }
  0xda   : > { %p877_p9 = pneg %p876_p3 }
  0xdc   : > { %p882_p13 = pnand %p881_p12, %p877_p9 }
 0x115   : > { %v354_v9 = vpop.permute.xlu2 %353 }
 0x116   : > { %356 = vst.msk [vmem:[%s1171_s17] sm:$0xf] %vm341_vm2, %v354_v9 }
 0x11d   : > { %v361_v10 = vpop.permute.xlu2 %360 }
 0x11e   : > { %675 = vst.msk [vmem:[%s1166_s30 + $0x4] sm:$0xf] %vm341_vm2, %v361_v10 }
 0x125   : > { %v401_v11 = vpop.permute.xlu2 %400 }
 0x126   : > { %680 = vst.msk [vmem:[%s1171_s17 + $0x8] sm:$0xf] %vm341_vm2, %v401_v11 }
 0x12d   : > { %v393_v12 = vpop.permute.xlu1 %392 }
 0x12e   : > { %679 = vst.msk [vmem:[%s290_s7 + $0x8] sm:$0xf] %vm341_vm2, %v393_v12  ;;  %v347_v13 = vpop.permute.xlu0 %346 }
 0x12f   : > { %349 = vst.msk [vmem:[%s290_s7] sm:$0xf] %vm341_vm2, %v347_v13 }
 0x135   : > { %v417_v14 = vpop.permute.xlu1 %416 }
 0x136   : > { %682 = vst.msk [vmem:[%s290_s7 + $0xc] sm:$0xf] %vm341_vm2, %v417_v14  ;;  %v369_v15 = vpop.permute.xlu0 %368 }
 0x137   : > { %676 = vst.msk [vmem:[%s290_s7 + $0x4] sm:$0xf] %vm341_vm2, %v369_v15 }
 0x138   : > { %885 = shalt.err (!%p882_p13)
}
 0x139   : > { %s1301_s7 = smov 4   ;;  %s1310_s25 = smov 64  }
 0x13a   : > { %707 = dma.vmem_to_hbm [thread:$0]  (%p1124_p4), %s472_s26, 256, %s474_s28, %s1192_s21, %s1310_s25, %s1310_s25, %s1301_s7  }
 0x13b   : > { %s452_s11 = scalar_lea.hbm %s1295_s3, %s1180_s6  ;;  %s488_s10 = scalar_lea.hbm %s1297_s5, %s1180_s6 }
 0x13c   : > { %s453_s27 = sshll.u32 %s1166_s30, 4  ;;  %s1221_s0 = sshll.u32 %s452_s11, 4  ;;  %s454_s27 = int_to_ptr.vmem [resolvable:$true] %s453_s27  ;;  %s456_s0 = int_to_ptr.hbm [resolvable:$true] %s1221_s0 }
 0x13d   : > { %v385_v16 = vpop.permute.xlu1 %384  ;;  %s489_s26 = sshll.u32 %s1171_s17, 4  ;;  %s1224_s28 = sshll.u32 %s488_s10, 4  ;;  %s1227_s26 = int_to_ptr.vmem [resolvable:$true] %s489_s26  ;;  %s492_s28 = int_to_ptr.hbm [resolvable:$true] %s1224_s28 }
 0x13e   : > { %678 = vst.msk [vmem:[%s1166_s30 + $0x8] sm:$0xf] %vm341_vm2, %v385_v16  ;;  %v377_v17 = vpop.permute.xlu0 %376  ;;  %s430_s6 = scalar_lea.sflag [#allocation5], %s1146_s8  ;;  %s900_s29 = sshra.s32 %s456_s0, 4  ;;  %s901_s29 = int_to_ptr.hbm [resolvable:$true] %s900_s29 }
 0x13f   : > { %677 = vst.msk [vmem:[%s1171_s17 + $0x4] sm:$0xf] %vm341_vm2, %v377_v17  ;;  %s902_s12 = scalar_lea.hbm %s901_s29, 16  ;;  %s906_s24 = scalar_lea.hbm %s1295_s3, 32 }
 0x140   : > { %p903_p0 = scmp.ne.s32.totalorder %s901_s29, %s902_s12  ;;  %p907_p8 = scmp.lt.s32.totalorder %s901_s29, %s1295_s3 }
 0x141   : > { %p908_p1 = scmp.lt.s32.totalorder %s906_s24, %s902_s12 }
 0x142   : > { %p904_p2 = pnand %p903_p0, %p1124_p4 }
 0x143   : > { %p909_p3 = por %p908_p1, %p907_p8 }
 0x144   : > { %p905_p5 = pneg %p904_p2 }
 0x145   : > { %v425_v18 = vpop.permute.xlu1 %424 }
 0x146   : > { %683 = vst.msk [vmem:[%s1171_s17 + $0xc] sm:$0xf] %vm341_vm2, %v425_v18  ;;  %v409_v19 = vpop.permute.xlu0 %408  ;;  %p910_p9 = pnand %p909_p3, %p905_p5 }
 0x147   : > { %681 = vst.msk [vmem:[%s1166_s30 + $0xc] sm:$0xf] %vm341_vm2, %v409_v19 }
 0x148   : > { %913 = shalt.err (!%p910_p9)
}
 0x149   : > { %s1311_s8 = smov 4   ;;  %s928_s30 = sshra.s32 %s492_s28, 4  ;;  %s929_s30 = int_to_ptr.hbm [resolvable:$true] %s928_s30 }
 0x14a   : > { %706 = dma.vmem_to_hbm [thread:$0]  (%p1124_p4), %s454_s27, 256, %s456_s0, %s430_s6, %s1310_s25, %s1310_s25, %s1311_s8  }
 0x14b   : > { %s930_s17 = scalar_lea.hbm %s929_s30, 16  ;;  %s934_s12 = scalar_lea.hbm %s1297_s5, 32 }
 0x14c   : > { %p931_p10 = scmp.ne.s32.totalorder %s929_s30, %s930_s17  ;;  %p935_p13 = scmp.lt.s32.totalorder %s929_s30, %s1297_s5 }
 0x14d   : > { %p936_p0 = scmp.lt.s32.totalorder %s934_s12, %s930_s17 }
 0x14e   : > { %p932_p11 = pnand %p931_p10, %p1124_p4 }
 0x14f   : > { %p937_p2 = por %p936_p0, %p935_p13 }
 0x150   : > { %p933_p12 = pneg %p932_p11 }
 0x152   : > { %p938_p5 = pnand %p937_p2, %p933_p12 }
 0x154   : > { %941 = shalt.err (!%p938_p5)
}
 0x155   : > { %708 = dma.vmem_to_hbm [thread:$0]  (%p1124_p4), %s1227_s26, 256, %s492_s28, %s1192_s21, %s1310_s25, %s1310_s25, %s1311_s8  }
 0x156 PF: > { %s506_s0 = sand.u32 1, %s984_s18   ;;  %p721_p8 = pnand %p657_p6, %p1132_p7 }
 0x157   : > { %s507_s27 = scalar_lea.sflag [#allocation5], %s506_s0 }
 0x158   : > { %p722_p1 = pneg %p721_p8 }
 0x15a   : > { %975 = dma.done.wait (%p722_p1), %s507_s27, 256  }
 0x15b   : > { %977 = vsyncadd (%p722_p1), %s507_s27, 4294967040  ;;  %s1312_s14 = sadd.s32 4294967294, %s1004_s23  }
 0x15c   : > { %s516_s6 = sand.u32 1, %s1312_s14  }
 0x15d   : > { %s517_s24 = scalar_lea.sflag [#allocation10], %s516_s6 }
 0x15e   : > { %979 = dma.done.wait (%p722_p1), %s517_s24, 512  }
 0x15f   : > { %981 = vsyncadd (%p722_p1), %s517_s24, 4294966784  ;;  %s26_s23 = sadd.s32 1, %s1004_s23   ;;  %s1313_s18 = smov %s988_s19 }
 0x160   : > { %p23_p4 = scmp.ge.s32.totalorder %s26_s23, 4   ;;  %s1314_s19 = smov %s992_s20 }
 0x161   : > { %s1315_s20 = smov %s1130_s15  ;;  %s1316_s21 = smov %s1000_s22 }
 0x162   : > { %s1317_s22 = smov %s1319_s9  ;;  %25 = sbr.rel (!%p23_p4) target bundleno = 11 (0xb), region = 122 }
 0x167   :  { %533 = vsyncpa [#allocation4], 1 }
 0x168   :  { %535 = vsyncpa [#allocation4 + $0x1], 1 }
 0x169   :  { %536 = vsyncpa [#allocation7], 1 }
 0x16a   :  { %537 = vsyncpa [#allocation5], 1 }
 0x16b   :  { %539 = vsyncpa [#allocation5 + $0x1], 1 }
 0x16c   :  { %540 = vsyncpa [#allocation10], 1 }
 0x16d   :  { %542 = vsyncpa [#allocation10 + $0x1], 1 }

// kernel: tpu_custom_call.1
= control target key start
LH: loop header
LB: loop body
LE: loop exit
PB: predicated region body
PF: predicated region fallthrough
CT: control target
= control target key end

     0   :  { %s1292_s0 = inlined_call_operand.hbm [shape: bf16[2,8,32], index: 0, kind: input, shape index: {}]   ;;  %s1293_s1 = inlined_call_operand.hbm [shape: bf16[32,96], index: 1, kind: input, shape index: {}]   ;;  %s1294_s2 = inlined_call_operand.vmem [shape: f32[1,96], index: 2, kind: input, shape index: {}]   ;;  %s1295_s3 = inlined_call_operand.hbm [shape: bf16[2,4,8,8], index: 3, kind: output, shape index: {0}]   ;;  %s1296_s4 = inlined_call_operand.hbm [shape: bf16[2,4,8,8], index: 4, kind: output, shape index: {1}]   ;;  %s1297_s5 = inlined_call_operand.hbm [shape: bf16[2,4,8,8], index: 5, kind: output, shape index: {2}]  }
   0x1   :  { %1303 = sst [smem:[#allocation16_spill]] %s1292_s0 }
   0x2   :  { %11 = vsyncpa [#allocation4], 0 }
   0x3   :  { %13 = vsyncpa [#allocation4 + $0x1], 0 }
   0x4   :  { %14 = vsyncpa [#allocation7], 0 }
   0x5   :  { %15 = vsyncpa [#allocation5], 0 }
   0x6   :  { %17 = vsyncpa [#allocation5 + $0x1], 0 }
   0x7   :  { %18 = vsyncpa [#allocation10], 0 }
   0x8   :  { %20 = vsyncpa [#allocation10 + $0x1], 0  ;;  %s1051_s18 = smov 0   ;;  %s1053_s19 = smov 0  }
   0x9   :  { %s1055_s20 = smov 0   ;;  %s1057_s21 = smov 0  }
   0xa   :  { %s1059_s22 = smov 0   ;;  %s1061_s23 = smov 0  }
   0xb LB: > { %s1082_s24 = sadd.s32 4294967295, %s1004_s23   ;;  %p655_p0 = scmp.ge.s32.totalorder %s1004_s23, 1  ;;  %s1004_s23 = sphi %s1061_s23, %s26_s23   ;;  %s1000_s22 = sphi %s1059_s22, %s1317_s22   ;;  %s996_s21 = sphi %s1057_s21, %s1316_s21   ;;  %s992_s20 = sphi %s1055_s20, %s1315_s20   ;;  %s988_s19 = sphi %s1053_s19, %s1314_s19   ;;  %s984_s18 = sphi %s1051_s18, %s1313_s18  }
   0xc   : > { %p61_p1 = scmp.eq.s32.totalorder %s1082_s24, 0  ;;  %p197_p2 = scmp.lt.s32.totalorder %s1004_s23, 3 }
   0xd   : > { %s208_s27 = sshll.u32 %s1293_s1, 4  ;;  %s1006_s29 = smov [#allocation6]   ;;  %s209_s27 = int_to_ptr.hbm [resolvable:$true] %s208_s27 }
   0xe   : > { %p1090_p3 = pnand %p655_p0, %p197_p2  ;;  %s210_s30 = sshll.u32 %s1006_s29, 4  ;;  %s211_s30 = int_to_ptr.vmem [resolvable:$true] %s210_s30 }
   0xf   : > { %p657_p6 = scmp.ge.s32.totalorder %s1004_s23, 2  ;;  %s1007_s6 = smov 64  }
  0x10   : > { %p712_p4 = pneg %p1090_p3  ;;  %s1008_s7 = smov 4  }
  0x11   : > { %s1298_s8 = sadd.s32 4294967294, %s1004_s23   ;;  %s38_s9 = sadd.s32 1, %s1000_s22 }
  0x12   : > { %p713_p5 = pnand %p712_p4, %p61_p1  ;;  %s47_s10 = sadd.s32 1, %s992_s20 }
  0x13   : > { %p40_p7 = scmp.ge.s32.totalorder %s38_s9, 2  ;;  %p54_p8 = scmp.ne.s32.totalorder %s992_s20, %s988_s19 }
  0x14   : > { %715 = dma.hbm_to_vmem [thread:$0]  (!%p713_p5), %s209_s27, 256, %s211_s30, [#allocation7], %s1007_s6, %s1007_s6, %s1008_s7  }
  0x15   : > { %p55_p9 = scmp.eq.s32.totalorder %s1004_s23, 0  ;;  %p60_p10 = scmp.ne.s32.totalorder %s988_s19, %s984_s18 }
  0x16   : > { %s1319_s9 = smov (%p40_p7, %s38_s9), 0  ;;  %p128_p13 = scmp.eq.s32.totalorder %s1082_s24, 1 }
  0x17   : > { %p1109_p11 = por %p55_p9, %p54_p8  ;;  %p1115_p12 = por %p61_p1, %p60_p10 }
  0x18   : > { %s42_s13 = ssub.s32 %s1000_s22, %s1319_s9  ;;  %p134_p2 = scmp.eq.s32.totalorder %s1298_s8, 1 }
  0x19   : > { %p45_p0 = scmp.eq.s32.totalorder %s42_s13, 0  ;;  %p1124_p4 = por %p128_p13, %p54_p8 }
  0x1a   : > { %p731_p5 = scmp.lt.s32.totalorder %s1004_s23, 2  ;;  %p1132_p7 = por %p134_p2, %p60_p10 }
  0x1b   : > { %s1130_s15 = scalar_select %p45_p0, %s992_s20, %s47_s10  }
  0x1c   : > { %s227_s17 = sand.u32 1, %s992_s20   ;;  %s659_s26 = sshll.u32 %s1000_s22, 2 }
  0x1d   : > { %s658_s25 = sshll.u32 %s227_s17, 2  ;;  %s1309_s0 = sld [smem:[#allocation16_spill]] }
  0x1e   : > { %s231_s6 = scalar_lea.vmem [#allocation3], %s658_s25  ;;  %p717_p8 = pnand %p731_p5, %p1109_p11 }
  0x1f   : > { %s240_s7 = sshll.u32 %s231_s6, 4  ;;  %s228_s10 = scalar_lea.sflag [#allocation4], %s227_s17  ;;  %s241_s7 = int_to_ptr.vmem [resolvable:$true] %s240_s7 }
  0x20   : > { %s1146_s8 = sand.u32 (!%p1090_p3), 1, %s988_s19  }
  0x21   : > { %249 = sbr.rel (%p1090_p3) target bundleno = 342 (0x156), region = 32  ;;  %s661_s27 = sshll.u32 (!%p1090_p3), %s1146_s8, 2 }
  0x22   : > { %s255_s25 = scalar_lea.vmem (!%p1090_p3), [#allocation3], %s661_s27 }
  0x23   : > { %s236_s30 = scalar_lea.hbm %s1309_s0, %s659_s26  ;;  %s252_s26 = scalar_lea.sflag (!%p1090_p3), [#allocation4], %s1146_s8 }
  0x24   : > { %s238_s13 = sshll.u32 %s236_s30, 4  ;;  %s239_s13 = int_to_ptr.hbm [resolvable:$true] %s238_s13 }
  0x25   : > { %719 = dma.hbm_to_vmem [thread:$0]  (!%p717_p8), %s239_s13, 64, %s241_s7, %s228_s10  }
  0x26   : > { %967 = dma.done.wait (%p1115_p12), %s252_s26, 64  }
  0x27   : > { %969 = vsyncadd (%p1115_p12), %s252_s26, 4294967232 }
  0x28   : > { %971 = dma.done.wait (%p61_p1), [#allocation7], 256  }
  0x29   : > { %973 = vsyncadd (%p61_p1), [#allocation7], 4294967040  ;;  %v696_v0 = vld [vmem:[#allocation6 + $0x8] sm:$0xff]  ;;  %v695_v1 = vld [vmem:[#allocation6] sm:$0xff]  ;;  %vm320_vm0 = vcmask 261120   ;;  %vm337_vm1 = vcmask 785408  }
  0x2a   : > { %330 = vmatpush.bf16.msra.mxu0 %v696_v0  ;;  %v299_v2 = vld [vmem:[%s255_s25] sm:$0xf]  ;;  %v797_v3 = vld [vmem:[%s1294_s2] ss:$0 sm:$0xff]  ;;  %s1162_s12 = sshll.u32 %s1146_s8, 4  ;;  %vm341_vm2 = vcmask 60416  }
  0x2b   : > { %s1009_s17 = smov 80   ;;  %s1299_s29 = smov 64  }
  0x2c   : > { %s1166_s30 = scalar_lea.vmem [#allocation8], %s1162_s12  ;;  %s1011_s6 = smov 96  }
  0x2d   : > { %s1012_s7 = smov 72   ;;  %s1013_s13 = smov 120  }
  0x2e   : > { %331 = vmatpush.bf16.msra.mxu0 %v695_v1  ;;  %s1014_s10 = smov 88   ;;  %s1015_s27 = smov 112  }
  0x2f   : > { %s1016_s26 = smov 48   ;;  %s1017_s25 = smov 56  }
  0x30   : > { %s1018_s28 = smov 40   ;;  %s1019_s11 = smov 104  }
  0x31   : > { %674 = vmatmul.msk.bf16.vlgmr.msra.gmra.mxu0 %vm320_vm0, %v299_v2 }
  0xae   : > { %v333_v4 = vpop.f32.mrf.mxu0 }
  0xaf   : > { %v334_v5 = vadd.f32 %v797_v3, %v333_v4 }
  0xb1   : > { %338 = vst.msk [vmem:[#allocation2] sm:$0xff] %vm337_vm1, %v334_v5 }
  0xb6   : > { %v335_v6 = vpop.f32.mrf.mxu0 }
  0xb8   : > { %v389_v7 = vld [vmem:[#allocation2] sm:$0xff] }
  0xb9   : > { %v390_v8 = vpack.c.bf16 %v389_v7, %v389_v7 }
  0xbb   : > { %392 = vrot.lane.b32.xlu1 %v390_v8, %s1009_s17  ;;  %353 = vrot.lane.b32.xlu2 %v390_v8, %s1299_s29  ;;  %342 = vst.msk [vmem:[%s1166_s30] sm:$0xf] %vm341_vm2, %v390_v8  ;;  %s1171_s17 = scalar_lea.vmem [#allocation11], %s1162_s12 }
  0xbc   : > { %346 = vrot.lane.b32.xlu0 %v390_v8, %s1011_s6  ;;  %s1180_s6 = sshll.u32 %s996_s21, 4 }
  0xc3   : > { %416 = vrot.lane.b32.xlu1 %v390_v8, %s1012_s7  ;;  %360 = vrot.lane.b32.xlu2 %v390_v8, %s1013_s13  ;;  %s290_s7 = scalar_lea.vmem [#allocation9], %s1162_s12 }
  0xc4   : > { %368 = vrot.lane.b32.xlu0 %v390_v8, %s1014_s10  ;;  %s878_s10 = scalar_lea.hbm %s1296_s4, 32 }
  0xcb   : > { %384 = vrot.lane.b32.xlu1 %v390_v8, %s1015_s27  ;;  %400 = vrot.lane.b32.xlu2 %v390_v8, %s1016_s26  ;;  %s470_s27 = scalar_lea.hbm %s1296_s4, %s1180_s6  ;;  %s471_s26 = sshll.u32 %s290_s7, 4  ;;  %s472_s26 = int_to_ptr.vmem [resolvable:$true] %s471_s26 }
  0xcc   : > { %376 = vrot.lane.b32.xlu0 %v390_v8, %s1017_s25  ;;  %s434_s25 = sand.u32 1, %s1082_s24  }
  0xcd   : > { %s1192_s21 = scalar_lea.sflag [#allocation10], %s434_s25 }
  0xd3   : > { %424 = vrot.lane.b32.xlu1 %v390_v8, %s1018_s28  ;;  %s473_s28 = sshll.u32 %s470_s27, 4  ;;  %s474_s28 = int_to_ptr.hbm [resolvable:$true] %s473_s28 }
  0xd4   : > { %408 = vrot.lane.b32.xlu0 %v390_v8, %s1019_s11  ;;  %s872_s12 = sshra.s32 %s474_s28, 4  ;;  %s873_s12 = int_to_ptr.hbm [resolvable:$true] %s872_s12 }
  0xd5   : > { %s874_s11 = scalar_lea.hbm %s873_s12, 16  ;;  %p879_p10 = scmp.lt.s32.totalorder %s873_s12, %s1296_s4 }
  0xd6   : > { %p875_p1 = scmp.ne.s32.totalorder %s873_s12, %s874_s11  ;;  %p880_p11 = scmp.lt.s32.totalorder %s878_s10, %s874_s11 }
  0xd8   : > { %p876_p3 = pnand %p875_p1, %p1124_p4  ;;  %p881_p12 = por %p880_p11, %p879_p10 }
  0xda   : > { %p877_p9 = pneg %p876_p3 }
  0xdc   : > { %p882_p13 = pnand %p881_p12, %p877_p9 }
 0x115   : > { %v354_v9 = vpop.permute.xlu2 %353 }
 0x116   : > { %356 = vst.msk [vmem:[%s1171_s17] sm:$0xf] %vm341_vm2, %v354_v9 }
 0x11d   : > { %v361_v10 = vpop.permute.xlu2 %360 }
 0x11e   : > { %675 = vst.msk [vmem:[%s1166_s30 + $0x4] sm:$0xf] %vm341_vm2, %v361_v10 }
 0x125   : > { %v401_v11 = vpop.permute.xlu2 %400 }
 0x126   : > { %680 = vst.msk [vmem:[%s1171_s17 + $0x8] sm:$0xf] %vm341_vm2, %v401_v11 }
 0x12d   : > { %v393_v12 = vpop.permute.xlu1 %392 }
 0x12e   : > { %679 = vst.msk [vmem:[%s290_s7 + $0x8] sm:$0xf] %vm341_vm2, %v393_v12  ;;  %v347_v13 = vpop.permute.xlu0 %346 }
 0x12f   : > { %349 = vst.msk [vmem:[%s290_s7] sm:$0xf] %vm341_vm2, %v347_v13 }
 0x135   : > { %v417_v14 = vpop.permute.xlu1 %416 }
 0x136   : > { %682 = vst.msk [vmem:[%s290_s7 + $0xc] sm:$0xf] %vm341_vm2, %v417_v14  ;;  %v369_v15 = vpop.permute.xlu0 %368 }
 0x137   : > { %676 = vst.msk [vmem:[%s290_s7 + $0x4] sm:$0xf] %vm341_vm2, %v369_v15 }
 0x138   : > { %885 = shalt.err (!%p882_p13)
}
 0x139   : > { %s1301_s7 = smov 4   ;;  %s1310_s25 = smov 64  }
 0x13a   : > { %707 = dma.vmem_to_hbm [thread:$0]  (%p1124_p4), %s472_s26, 256, %s474_s28, %s1192_s21, %s1310_s25, %s1310_s25, %s1301_s7  }
 0x13b   : > { %s452_s11 = scalar_lea.hbm %s1295_s3, %s1180_s6  ;;  %s488_s10 = scalar_lea.hbm %s1297_s5, %s1180_s6 }
 0x13c   : > { %s453_s27 = sshll.u32 %s1166_s30, 4  ;;  %s1221_s0 = sshll.u32 %s452_s11, 4  ;;  %s454_s27 = int_to_ptr.vmem [resolvable:$true] %s453_s27  ;;  %s456_s0 = int_to_ptr.hbm [resolvable:$true] %s1221_s0 }
 0x13d   : > { %v385_v16 = vpop.permute.xlu1 %384  ;;  %s489_s26 = sshll.u32 %s1171_s17, 4  ;;  %s1224_s28 = sshll.u32 %s488_s10, 4  ;;  %s1227_s26 = int_to_ptr.vmem [resolvable:$true] %s489_s26  ;;  %s492_s28 = int_to_ptr.hbm [resolvable:$true] %s1224_s28 }
 0x13e   : > { %678 = vst.msk [vmem:[%s1166_s30 + $0x8] sm:$0xf] %vm341_vm2, %v385_v16  ;;  %v377_v17 = vpop.permute.xlu0 %376  ;;  %s430_s6 = scalar_lea.sflag [#allocation5], %s1146_s8  ;;  %s900_s29 = sshra.s32 %s456_s0, 4  ;;  %s901_s29 = int_to_ptr.hbm [resolvable:$true] %s900_s29 }
 0x13f   : > { %677 = vst.msk [vmem:[%s1171_s17 + $0x4] sm:$0xf] %vm341_vm2, %v377_v17  ;;  %s902_s12 = scalar_lea.hbm %s901_s29, 16  ;;  %s906_s24 = scalar_lea.hbm %s1295_s3, 32 }
 0x140   : > { %p903_p0 = scmp.ne.s32.totalorder %s901_s29, %s902_s12  ;;  %p907_p8 = scmp.lt.s32.totalorder %s901_s29, %s1295_s3 }
 0x141   : > { %p908_p1 = scmp.lt.s32.totalorder %s906_s24, %s902_s12 }
 0x142   : > { %p904_p2 = pnand %p903_p0, %p1124_p4 }
 0x143   : > { %p909_p3 = por %p908_p1, %p907_p8 }
 0x144   : > { %p905_p5 = pneg %p904_p2 }
 0x145   : > { %v425_v18 = vpop.permute.xlu1 %424 }
 0x146   : > { %683 = vst.msk [vmem:[%s1171_s17 + $0xc] sm:$0xf] %vm341_vm2, %v425_v18  ;;  %v409_v19 = vpop.permute.xlu0 %408  ;;  %p910_p9 = pnand %p909_p3, %p905_p5 }
 0x147   : > { %681 = vst.msk [vmem:[%s1166_s30 + $0xc] sm:$0xf] %vm341_vm2, %v409_v19 }
 0x148   : > { %913 = shalt.err (!%p910_p9)
}
 0x149   : > { %s1311_s8 = smov 4   ;;  %s928_s30 = sshra.s32 %s492_s28, 4  ;;  %s929_s30 = int_to_ptr.hbm [resolvable:$true] %s928_s30 }
 0x14a   : > { %706 = dma.vmem_to_hbm [thread:$0]  (%p1124_p4), %s454_s27, 256, %s456_s0, %s430_s6, %s1310_s25, %s1310_s25, %s1311_s8  }
 0x14b   : > { %s930_s17 = scalar_lea.hbm %s929_s30, 16  ;;  %s934_s12 = scalar_lea.hbm %s1297_s5, 32 }
 0x14c   : > { %p931_p10 = scmp.ne.s32.totalorder %s929_s30, %s930_s17  ;;  %p935_p13 = scmp.lt.s32.totalorder %s929_s30, %s1297_s5 }
 0x14d   : > { %p936_p0 = scmp.lt.s32.totalorder %s934_s12, %s930_s17 }
 0x14e   : > { %p932_p11 = pnand %p931_p10, %p1124_p4 }
 0x14f   : > { %p937_p2 = por %p936_p0, %p935_p13 }
 0x150   : > { %p933_p12 = pneg %p932_p11 }
 0x152   : > { %p938_p5 = pnand %p937_p2, %p933_p12 }
 0x154   : > { %941 = shalt.err (!%p938_p5)
}
 0x155   : > { %708 = dma.vmem_to_hbm [thread:$0]  (%p1124_p4), %s1227_s26, 256, %s492_s28, %s1192_s21, %s1310_s25, %s1310_s25, %s1311_s8  }
 0x156 PF: > { %s506_s0 = sand.u32 1, %s984_s18   ;;  %p721_p8 = pnand %p657_p6, %p1132_p7 }
 0x157   : > { %s507_s27 = scalar_lea.sflag [#allocation5], %s506_s0 }
 0x158   : > { %p722_p1 = pneg %p721_p8 }
 0x15a   : > { %975 = dma.done.wait (%p722_p1), %s507_s27, 256  }
 0x15b   : > { %977 = vsyncadd (%p722_p1), %s507_s27, 4294967040  ;;  %s1312_s14 = sadd.s32 4294967294, %s1004_s23  }
 0x15c   : > { %s516_s6 = sand.u32 1, %s1312_s14  }
 0x15d   : > { %s517_s24 = scalar_lea.sflag [#allocation10], %s516_s6 }
 0x15e   : > { %979 = dma.done.wait (%p722_p1), %s517_s24, 512  }
 0x15f   : > { %981 = vsyncadd (%p722_p1), %s517_s24, 4294966784  ;;  %s26_s23 = sadd.s32 1, %s1004_s23   ;;  %s1313_s18 = smov %s988_s19 }
 0x160   : > { %p23_p4 = scmp.ge.s32.totalorder %s26_s23, 4   ;;  %s1314_s19 = smov %s992_s20 }
 0x161   : > { %s1315_s20 = smov %s1130_s15  ;;  %s1316_s21 = smov %s1000_s22 }
 0x162   : > { %s1317_s22 = smov %s1319_s9  ;;  %25 = sbr.rel (!%p23_p4) target bundleno = 11 (0xb), region = 122 }
 0x167   :  { %533 = vsyncpa [#allocation4], 1 }
 0x168   :  { %535 = vsyncpa [#allocation4 + $0x1], 1 }
 0x169   :  { %536 = vsyncpa [#allocation7], 1 }
 0x16a   :  { %537 = vsyncpa [#allocation5], 1 }
 0x16b   :  { %539 = vsyncpa [#allocation5 + $0x1], 1 }
 0x16c   :  { %540 = vsyncpa [#allocation10], 1 }
 0x16d   :  { %542 = vsyncpa [#allocation10 + $0x1], 1 }

</bundles_post_ra>
